<compile_context>
chip_gen: v5e
topology: v5e:2x2
jax: 0.10.0
libtpu: 0.0.40
codegen_flags: <defaults>
</compile_context>

<pallas_src>
import jax
import jax.numpy as jnp
from jax.experimental import pallas as pl
from jax.experimental.pallas import tpu as pltpu


def _scalar_forward_kernel(const_ref, out_ref):
    # Pure scalar path: one SMEM load + one SMEM store.  No vregs, no vector
    # store slot, no (8,128) padding.
    out_ref[0, 0] = const_ref[0, 0]


@jax.jit
def scalar_forward(constant_2d: jax.Array) -> jax.Array:
    """Emits the scalar parameter via a (minimal) Pallas kernel.

    Args:
      constant_2d: (1, 1) float32 array holding the parameter value.

    Returns:
      () float32 array equal to the parameter (same semantics as
      Scalar.forward() returning `self.constant`).
    """
    out_2d = pl.pallas_call(
        _scalar_forward_kernel,
        out_shape=jax.ShapeDtypeStruct((1, 1), jnp.float32),
        # Keep the 4-byte value on the scalar path end to end.
        in_specs=[pl.BlockSpec(memory_space=pltpu.MemorySpace.SMEM)],
        out_specs=pl.BlockSpec(memory_space=pltpu.MemorySpace.SMEM),
        # Output aliases the input buffer: no extra output allocation/writeback.
        input_output_aliases={0: 0},
    )(constant_2d)
    return out_2d.reshape(())  # 0-d, like torch's 0-d nn.Parameter


class ScalarPallas:
    """Minimal JAX-side analogue of the PyTorch Scalar module."""

    def __init__(self, init_value: float):
        # Deterministic parameter init straight from the constructor arg,
        # exactly like nn.Parameter(torch.tensor(init_value)).
        self.constant = jnp.full((1, 1), init_value, dtype=jnp.float32)

    def __call__(self) -> jax.Array:
        # Preferred (kernel-free) path would be:  return self.constant.reshape(())
        # The Pallas path below is kept because a kernel is required here.
        return scalar_forward(self.constant)


if __name__ == "__main__":
    # forward() takes no tensor inputs; PRNGKey(0) only picks a deterministic
    # init value (mirrors e.g. log_alpha init in CQL).
    key = jax.random.PRNGKey(0)
    init_value = float(jax.random.uniform(key, (), minval=-1.0, maxval=1.0))

    module = ScalarPallas(init_value)
    out = module()
    jax.block_until_ready(out)

    expected = jnp.float32(init_value)
    assert out.shape == (), f"expected 0-d output, got shape {out.shape}"
    assert out.dtype == jnp.float32, f"expected float32, got {out.dtype}"
    assert jnp.allclose(out, expected), (out, expected)

    print("KERNEL_OK")
</pallas_src>

<mosaic_0001>
module attributes {stable_mosaic.version = 11 : i64} {
  func.func @_scalar_forward_kernel(%arg0: memref<1x1xf32, #tpu.memory_space<smem>>, %arg1: memref<1x1xf32, #tpu.memory_space<smem>>) attributes {dimension_semantics = [], scalar_prefetch = 0 : i64, scratch_operands = 0 : i64, tpu.core_type = #tpu.core_type<tc>} {
    %c0 = arith.constant 0 : index
    %c0_0 = arith.constant 0 : index
    %0 = memref.load %arg0[%c0, %c0_0] : memref<1x1xf32, #tpu.memory_space<smem>>
    %c0_1 = arith.constant 0 : index
    %c0_2 = arith.constant 0 : index
    %1 = memref.load %arg1[%c0_1, %c0_2] : memref<1x1xf32, #tpu.memory_space<smem>>
    memref.store %0, %arg1[%c0_1, %c0_2] : memref<1x1xf32, #tpu.memory_space<smem>>
    return
  }
}

</mosaic_0001>

<bundles_post_ra>
// kernel: scalar_forward.1
= control target key start
LH: loop header
LB: loop body
LE: loop exit
PB: predicated region body
PF: predicated region fallthrough
CT: control target
= control target key end

     0   :  { %7 = vsyncpa [#allocation4], 0  ;;  %s43_s11 = smov [#allocation3]   ;;  %s60_s0 = inlined_call_operand.<no memory space> [shape: f32[1,1], index: 0, kind: input, shape index: {}, may-alias: {0,1}]   ;;  %s61_s1 = inlined_call_operand.hbm [shape: f32[1,1], index: 1, kind: output, shape index: {}, may-alias: {0,1}]  }
   0x1   :  { %12 = sst [smem:[#allocation3]] %s60_s0  ;;  %s18_s10 = sshll.u32 %s61_s1, 4  ;;  %s19_s10 = int_to_ptr.hbm [resolvable:$true] %s18_s10 }
   0x2   :  { %21 = dma.smem_to_hbm %s43_s11, 16, %s19_s10, [#allocation4]  }
   0x3   :  { %41 = dma.done.wait [#allocation4], 16  }
   0x4   :  { %42 = vsyncadd [#allocation4], 4294967280 }
   0x5   :  { %26 = sfence }
   0x6   :  { %27 = vsyncpa [#allocation4], 1 }

</bundles_post_ra>
